<compile_context>
chip_gen: v5e
topology: v5e:2x2
jax: 0.10.0
libtpu: 0.0.40
codegen_flags: <defaults>
</compile_context>

<pallas_src>
import functools

import jax
import jax.numpy as jnp
from jax import lax
from jax.experimental import pallas as pl
from jax.experimental.pallas import tpu as pltpu


def _round_up(x, m):
    return ((x + m - 1) // m) * m


def _infonce_kernel(inv_temperature,
                    emb_ref, grp_col_ref, grp_row_ref, msk_col_ref, msk_row_ref,
                    out_ref, zn_ref, den_ref, num_ref):
    # emb_ref:     (BB, Np, Dp) input dtype     resident per batch block i
    # grp_col_ref: (BB, 1,  TJ) int32           groups of column tile j (lane)
    # grp_row_ref: (BB, Np, 1 ) int32           row groups, resident per i
    # msk_col_ref: (BB, 1,  TJ) float32         keep-mask of column tile j
    # msk_row_ref: (1,  BB, Np) float32         lane-dense row keep-mask
    # out_ref:     (1, 8, 128)  float32         sublane0 = loss sum, sublane1 = #anchors
    # zn_ref:      (BB, Np, Dp) matmul dtype    normalized embeddings (scratch)
    # den_ref/num_ref: (BB, Np) float32         running row sums (scratch)
    j = pl.program_id(1)
    ncj = pl.num_programs(1)
    bb, np_, _ = emb_ref.shape
    tj = msk_col_ref.shape[-1]

    @pl.when(j == 0)
    def _init():
        # L2 normalize once per batch block (F.normalize, eps=1e-12):
        # rsqrt + mul instead of sqrt + div; reused by every column tile.
        x = emb_ref[...].astype(jnp.float32)
        ssq = jnp.sum(x * x, axis=-1, keepdims=True)
        zn = x * lax.rsqrt(jnp.maximum(ssq, 1e-24))
        zn_ref[...] = zn.astype(zn_ref.dtype)
        den_ref[...] = jnp.zeros_like(den_ref)
        num_ref[...] = jnp.zeros_like(num_ref)

    # Column tile of the (same) normalized embeddings, sliced from VMEM scratch.
    j0 = pl.multiple_of(j * tj, tj)
    z_cols = zn_ref[:, pl.ds(j0, tj), :]                            # (BB, TJ, Dp)

    # Batched "nt" matmul on the MXU: contract D of both operands directly
    # (no transpose), f32 accumulation; operands stay bf16 on the bf16 path.
    sim = lax.dot_general(
        zn_ref[...], z_cols,
        dimension_numbers=(((2,), (2,)), ((0,), (0,))),
        preferred_element_type=jnp.float32) * inv_temperature       # (BB, Np, TJ)

    # Fused masking: diagonal exclusion + masked-out columns in one select.
    ri = lax.broadcasted_iota(jnp.int32, (np_, tj), 0)
    ci = lax.broadcasted_iota(jnp.int32, (np_, tj), 1) + j * tj
    keep = jnp.logical_and((ri != ci)[None, :, :],
                           msk_col_ref[...] > 0.5)                  # (BB, Np, TJ)

    # TODO(synk): no per-row max subtraction before exp -- exact parity with
    # the PyTorch reference; safe for temperature ~0.1, overflows for T << 0.012.
    e = jnp.where(keep, jnp.exp(sim), 0.0)
    pos = grp_row_ref[...] == grp_col_ref[...]                      # (BB, Np, TJ)

    # Running row sums. (If a bundle dump showed these cross-lane reduces on
    # the critical path they could move to the MXU via e @ ones(TJ, 128).)
    den_ref[...] += jnp.sum(e, axis=-1)
    num_ref[...] += jnp.sum(jnp.where(pos, e, 0.0), axis=-1)

    @pl.when(j == ncj - 1)
    def _finalize():
        den = den_ref[...]
        num = num_ref[...]
        row_keep = msk_row_ref[...].reshape(bb, np_) > 0.5
        valid = jnp.logical_and(num > 0.0, row_keep)
        num_s = jnp.where(valid, num, 1.0)                          # avoid log(0)
        den_s = jnp.where(valid, den, 1.0)
        per_anchor = jnp.where(valid, -jnp.log(num_s / den_s), 0.0)  # one log
        loss_blk = jnp.sum(per_anchor)
        cnt_blk = jnp.sum(valid.astype(jnp.float32))
        rows = lax.broadcasted_iota(jnp.int32, out_ref.shape, 1)
        out_ref[...] = jnp.where(rows == 0, loss_blk,
                                 jnp.where(rows == 1, cnt_blk, 0.0))


def infonce_loss(embeddings, groups, mask=None, temperature=0.1,
                 use_bf16_matmul=False):
    """embeddings: [B, N, D] float; groups: [B, N] int; mask: [B, N] bool or None."""
    B, N, D = embeddings.shape
    if mask is None:
        mask = jnp.ones((B, N), dtype=bool)

    # Keep bf16/f32 inputs in their native dtype through the DMA / MXU.
    if embeddings.dtype != jnp.float32 and embeddings.dtype != jnp.bfloat16:
        embeddings = embeddings.astype(jnp.float32)
    in_dtype = embeddings.dtype
    mm_dtype = jnp.bfloat16 if (in_dtype == jnp.bfloat16 or use_bf16_matmul) \
        else jnp.float32

    # ---- lane / sublane dense padding & column-tile size -------------------
    sub_mult = 16 if mm_dtype == jnp.bfloat16 else 8
    if N < 64:
        Np = _round_up(max(N, sub_mult), sub_mult)
        TJ = Np                                    # single column tile
    else:
        Np = _round_up(N, 128)                     # full MXU / unmasked vregs
        TJ = 256 if Np % 256 == 0 else 128
    ncj = Np // TJ
    Dp = _round_up(max(D, 128), 128)

    # ---- generation-aware VMEM budget & batch-block size -------------------
    try:
        info = pltpu.get_tpu_info()
        vmem_cap = int(getattr(info, "vmem_capacity_bytes", 64 * 1024 * 1024))
    except Exception:
        vmem_cap = 64 * 1024 * 1024
    if vmem_cap >= 100 * 1024 * 1024:              # v5e / v6e: 128 MiB physical
        budget = 88 * 1024 * 1024
        vmem_limit = 110 * 1024 * 1024
    else:                                          # v7x: 64 MiB physical
        budget = 24 * 1024 * 1024
        vmem_limit = 48 * 1024 * 1024

    in_item = jnp.dtype(in_dtype).itemsize
    mm_item = jnp.dtype(mm_dtype).itemsize
    bytes_per_b = (
        2 * Np * Dp * in_item          # embeddings block (double-buffered)
        + 2 * Np * Dp * 4              # f32 normalization temporaries (j == 0)
        + Np * Dp * mm_item            # normalized-embedding scratch
        + 2 * Np * 128 * 4             # row-layout groups (lane-padded, 2 bufs)
        + 5 * Np * TJ * 4              # sim / exp / keep / pos temporaries
        + 4 * TJ * 8 * 4               # column groups + column mask blocks
        + 6 * Np * 4                   # row mask + den/num accumulators
    )
    bb_parallel_cap = max(1, (B + 1) // 2)   # >=2 'parallel' steps for v7x 2 TCs
    BB = int(max(1, min(bb_parallel_cap, 512, budget // max(bytes_per_b, 1))))
    nb = -(-B // BB)
    Bp = nb * BB

    # ---- pad & lay out host-side --------------------------------------------
    emb = embeddings
    if (Bp, Np, Dp) != (B, N, D):
        emb = jnp.pad(embeddings, ((0, Bp - B), (0, Np - N), (0, Dp - D)))

    grp = groups.astype(jnp.int32)
    msk = mask.astype(jnp.float32)
    if (Bp, Np) != (B, N):
        # Padded rows/cols are excluded via mask == 0; pad group value is moot.
        grp = jnp.pad(grp, ((0, Bp - B), (0, Np - N)),
                      constant_values=jnp.iinfo(jnp.int32).min)
        msk = jnp.pad(msk, ((0, Bp - B), (0, Np - N)))

    grp_lane = grp.reshape(Bp, 1, Np)   # column groups (lane dense, tiled over j)
    grp_row = grp.reshape(Bp, Np, 1)    # row groups (resident per batch block)
    msk_lane = msk.reshape(Bp, 1, Np)   # column keep-mask (tiled over j)
    msk_row = msk.reshape(nb, BB, Np)   # lane-dense row keep-mask (finalize only)

    kernel = functools.partial(_infonce_kernel, float(1.0 / temperature))

    parts = pl.pallas_call(
        kernel,
        out_shape=jax.ShapeDtypeStruct((nb, 8, 128), jnp.float32),
        grid_spec=pltpu.PrefetchScalarGridSpec(
            num_scalar_prefetch=0,
            grid=(nb, ncj),
            in_specs=[
                pl.BlockSpec((BB, Np, Dp), lambda i, j: (i, 0, 0)),
                pl.BlockSpec((BB, 1, TJ), lambda i, j: (i, 0, j)),
                pl.BlockSpec((BB, Np, 1), lambda i, j: (i, 0, 0)),
                pl.BlockSpec((BB, 1, TJ), lambda i, j: (i, 0, j)),
                pl.BlockSpec((1, BB, Np), lambda i, j: (i, 0, 0)),
            ],
            out_specs=pl.BlockSpec((1, 8, 128), lambda i, j: (i, 0, 0)),
            scratch_shapes=[
                pltpu.VMEM((BB, Np, Dp), mm_dtype),   # normalized embeddings
                pltpu.VMEM((BB, Np), jnp.float32),    # running denominator
                pltpu.VMEM((BB, Np), jnp.float32),    # running numerator
            ],
        ),
        compiler_params=pltpu.CompilerParams(
            dimension_semantics=("parallel", "arbitrary"),
            vmem_limit_bytes=int(vmem_limit),
        ),
    )(emb, grp_lane, grp_row, msk_lane, msk_row)

    loss_sum = jnp.sum(parts[:, 0, 0])
    total = jnp.sum(parts[:, 1, 0])
    return jnp.where(total > 0, loss_sum / jnp.maximum(total, 1.0), 0.0)


def _infonce_ref(embeddings, groups, mask, temperature=0.1):
    """Pure-JAX reference with identical semantics (mirrors the PyTorch code)."""
    B, N, _ = embeddings.shape
    total_loss = 0.0
    total_anchors = 0.0
    for b in range(B):
        z = embeddings[b].astype(jnp.float32)
        g = groups[b]
        m = mask[b].astype(jnp.float32)
        norm = jnp.sqrt(jnp.sum(z * z, axis=-1, keepdims=True))
        zn = z / jnp.maximum(norm, 1e-12)
        sim = zn @ zn.T / temperature
        not_diag = 1.0 - jnp.eye(N, dtype=jnp.float32)
        exp_sim = jnp.exp(sim) * not_diag * m[None, :]
        pos = (g[None, :] == g[:, None]).astype(jnp.float32)
        den = jnp.sum(exp_sim, axis=1)
        num = jnp.sum(exp_sim * pos, axis=1)
        valid = jnp.logical_and(num > 0, m > 0.5)
        loss_b = jnp.where(valid, -(jnp.log(num) - jnp.log(den)), 0.0)
        total_loss = total_loss + jnp.sum(loss_b)
        total_anchors = total_anchors + jnp.sum(valid.astype(jnp.float32))
    return jnp.where(total_anchors > 0,
                     total_loss / jnp.maximum(total_anchors, 1.0), 0.0)


if __name__ == "__main__":
    key = jax.random.PRNGKey(0)

    # Case 1: tiny shapes typical of the module.
    k1, k2, k3, key = jax.random.split(key, 4)
    B, N, D = 2, 8, 32
    emb = jax.random.normal(k1, (B, N, D), dtype=jnp.float32)
    grp = jax.random.randint(k2, (B, N), 0, 3, dtype=jnp.int32)
    msk = jax.random.uniform(k3, (B, N)) > 0.2
    out = jax.block_until_ready(infonce_loss(emb, grp, msk, temperature=0.1))
    ref = _infonce_ref(emb, grp, msk, temperature=0.1)
    assert jnp.allclose(out, ref, rtol=1e-4, atol=1e-5), (out, ref)

    # Case 2: exercises batch blocking (nb > 1), 128-lane padding and
    # multiple column tiles (ncj > 1) plus masked-out rows.
    k1, k2, k3, key = jax.random.split(key, 4)
    B, N, D = 3, 300, 72
    emb = jax.random.normal(k1, (B, N, D), dtype=jnp.float32)
    grp = jax.random.randint(k2, (B, N), 0, 5, dtype=jnp.int32)
    msk = jax.random.uniform(k3, (B, N)) > 0.25
    out = jax.block_until_ready(infonce_loss(emb, grp, msk, temperature=0.1))
    ref = _infonce_ref(emb, grp, msk, temperature=0.1)
    assert jnp.allclose(out, ref, rtol=5e-4, atol=1e-4), (out, ref)

    # Case 3: mask=None default path.
    k1, k2, key = jax.random.split(key, 3)
    B, N, D = 2, 16, 32
    emb = jax.random.normal(k1, (B, N, D), dtype=jnp.float32)
    grp = jax.random.randint(k2, (B, N), 0, 4, dtype=jnp.int32)
    out = jax.block_until_ready(infonce_loss(emb, grp, None, temperature=0.1))
    ref = _infonce_ref(emb, grp, jnp.ones((B, N), dtype=bool), temperature=0.1)
    assert jnp.allclose(out, ref, rtol=1e-4, atol=1e-5), (out, ref)

    # Case 4: opt-in bf16 MXU operands (trades exact f32 parity for throughput).
    out_bf16 = jax.block_until_ready(
        infonce_loss(emb, grp, None, temperature=0.1, use_bf16_matmul=True))
    assert bool(jnp.isfinite(out_bf16)), out_bf16

    print("KERNEL_OK")
</pallas_src>

<mosaic_0001>
module attributes {stable_mosaic.version = 11 : i64} {
  func.func @_infonce_kernel(%arg0: i32, %arg1: i32, %arg2: memref<1x8x128xf32, #tpu.memory_space<vmem>>, %arg3: memref<1x1x8xi32, #tpu.memory_space<vmem>>, %arg4: memref<1x8x1xi32, #tpu.memory_space<vmem>>, %arg5: memref<1x1x8xf32, #tpu.memory_space<vmem>>, %arg6: memref<1x1x8xf32, #tpu.memory_space<vmem>>, %arg7: memref<1x8x128xf32, #tpu.memory_space<vmem>>, %arg8: memref<1x8x128xf32, #tpu.memory_space<vmem>>, %arg9: memref<1x8xf32, #tpu.memory_space<vmem>>, %arg10: memref<1x8xf32, #tpu.memory_space<vmem>>) attributes {dimension_semantics = [#tpu.dimension_semantics<parallel>, #tpu.dimension_semantics<arbitrary>], iteration_bounds = array<i64: 2, 1>, scalar_prefetch = 0 : i64, scratch_operands = 3 : i64, tpu.core_type = #tpu.core_type<tc>, window_params = [{transform_indices = @transform_0, window_bounds = array<i64: 1, 8, 128>}, {transform_indices = @transform_1, window_bounds = array<i64: 1, 1, 8>}, {transform_indices = @transform_2, window_bounds = array<i64: 1, 8, 1>}, {transform_indices = @transform_3, window_bounds = array<i64: 1, 1, 8>}, {transform_indices = @transform_4, window_bounds = array<i64: 1, 1, 8>}, {transform_indices = @transform_5, window_bounds = array<i64: 1, 8, 128>}]} {
    %c0_i32 = arith.constant 0 : i32
    %0 = arith.cmpi eq, %arg1, %c0_i32 : i32
    %1 = arith.extui %0 : i1 to i32
    %c0_i32_0 = arith.constant 0 : i32
    %2 = arith.cmpi ne, %1, %c0_i32_0 : i32
    scf.if %2 {
      %c0_31 = arith.constant 0 : index
      %c0_32 = arith.constant 0 : index
      %c0_33 = arith.constant 0 : index
      %44 = vector.load %arg2[%c0_31, %c0_32, %c0_33] : memref<1x8x128xf32, #tpu.memory_space<vmem>>, vector<1x8x128xf32>
      %45 = arith.mulf %44, %44 : vector<1x8x128xf32>
      %cst_34 = arith.constant dense<0.000000e+00> : vector<1x8xf32>
      %46 = vector.multi_reduction <add>, %45, %cst_34 [2] : vector<1x8x128xf32> to vector<1x8xf32>
      %47 = vector.shape_cast %46 : vector<1x8xf32> to vector<1x8x1xf32>
      %cst_35 = arith.constant 1.000000e-24 : f32
      %48 = vector.broadcast %cst_35 : f32 to vector<1x8x1xf32>
      %49 = arith.maximumf %47, %48 : vector<1x8x1xf32>
      %50 = math.rsqrt %49 : vector<1x8x1xf32>
      %51 = vector.broadcast %50 : vector<1x8x1xf32> to vector<1x8x128xf32>
      %52 = arith.mulf %44, %51 : vector<1x8x128xf32>
      %c0_36 = arith.constant 0 : index
      %c0_37 = arith.constant 0 : index
      %c0_38 = arith.constant 0 : index
      %53 = vector.load %arg8[%c0_36, %c0_37, %c0_38] : memref<1x8x128xf32, #tpu.memory_space<vmem>>, vector<1x8x128xf32>
      tpu.vector_store %arg8[%c0_36, %c0_37, %c0_38], %52 {strides = array<i32>} : memref<1x8x128xf32, #tpu.memory_space<vmem>>, vector<1x8x128xf32>,
      %cst_39 = arith.constant 0.000000e+00 : f32
      %54 = vector.broadcast %cst_39 : f32 to vector<1x8xf32>
      %c0_40 = arith.constant 0 : index
      %c0_41 = arith.constant 0 : index
      %55 = vector.load %arg9[%c0_40, %c0_41] : memref<1x8xf32, #tpu.memory_space<vmem>>, vector<1x8xf32>
      tpu.vector_store %arg9[%c0_40, %c0_41], %54 {strides = array<i32>} : memref<1x8xf32, #tpu.memory_space<vmem>>, vector<1x8xf32>,
      %cst_42 = arith.constant 0.000000e+00 : f32
      %56 = vector.broadcast %cst_42 : f32 to vector<1x8xf32>
      %c0_43 = arith.constant 0 : index
      %c0_44 = arith.constant 0 : index
      %57 = vector.load %arg10[%c0_43, %c0_44] : memref<1x8xf32, #tpu.memory_space<vmem>>, vector<1x8xf32>
      tpu.vector_store %arg10[%c0_43, %c0_44], %56 {strides = array<i32>} : memref<1x8xf32, #tpu.memory_space<vmem>>, vector<1x8xf32>,
    } else {
    }
    %c8_i32 = arith.constant 8 : i32
    %3 = arith.muli %arg1, %c8_i32 : i32
    %4 = tpu.assume_multiple %3, 8 : i32
    %c0 = arith.constant 0 : index
    %5 = arith.index_cast %4 : i32 to index
    %c0_1 = arith.constant 0 : index
    %6 = vector.load %arg8[%c0, %5, %c0_1] : memref<1x8x128xf32, #tpu.memory_space<vmem>>, vector<1x8x128xf32>
    %c0_2 = arith.constant 0 : index
    %c0_3 = arith.constant 0 : index
    %c0_4 = arith.constant 0 : index
    %7 = vector.load %arg8[%c0_2, %c0_3, %c0_4] : memref<1x8x128xf32, #tpu.memory_space<vmem>>, vector<1x8x128xf32>
    %cst = arith.constant dense<0.000000e+00> : vector<1x8x8xf32>
    %8 = tpu.matmul %7, %6, %cst {dimension_numbers = #tpu.dot_dimension_numbers<[2], [2], [1], [1], [0, 0, 0, 1, 1, 1], [0], [0]>} : vector<1x8x128xf32>, vector<1x8x128xf32>, vector<1x8x8xf32> -> vector<1x8x8xf32>
    %cst_5 = arith.constant 1.000000e+01 : f32
    %9 = vector.broadcast %cst_5 : f32 to vector<1x8x8xf32>
    %10 = arith.mulf %8, %9 : vector<1x8x8xf32>
    %11 = tpu.iota {dimensions = array<i32: 0>} : vector<8x8xi32>
    %12 = tpu.iota {dimensions = array<i32: 1>} : vector<8x8xi32>
    %c8_i32_6 = arith.constant 8 : i32
    %13 = arith.muli %arg1, %c8_i32_6 : i32
    %14 = vector.broadcast %13 : i32 to vector<8x8xi32>
    %15 = arith.addi %12, %14 : vector<8x8xi32>
    %16 = arith.cmpi ne, %11, %15 : vector<8x8xi32>
    %17 = vector.shape_cast %16 : vector<8x8xi1> to vector<1x8x8xi1>
    %c0_7 = arith.constant 0 : index
    %c0_8 = arith.constant 0 : index
    %c0_9 = arith.constant 0 : index
    %18 = vector.load %arg5[%c0_7, %c0_8, %c0_9] : memref<1x1x8xf32, #tpu.memory_space<vmem>>, vector<1x1x8xf32>
    %cst_10 = arith.constant 5.000000e-01 : f32
    %19 = vector.broadcast %cst_10 : f32 to vector<1x1x8xf32>
    %20 = arith.cmpf ogt, %18, %19 : vector<1x1x8xf32>
    %21 = vector.broadcast %20 : vector<1x1x8xi1> to vector<1x8x8xi1>
    %22 = arith.andi %17, %21 : vector<1x8x8xi1>
    %23 = math.exp %10 : vector<1x8x8xf32>
    %cst_11 = arith.constant 0.000000e+00 : f32
    %24 = vector.broadcast %cst_11 : f32 to vector<1x8x8xf32>
    %25 = arith.select %22, %23, %24 : vector<1x8x8xi1>, vector<1x8x8xf32>
    %c0_12 = arith.constant 0 : index
    %c0_13 = arith.constant 0 : index
    %c0_14 = arith.constant 0 : index
    %26 = vector.load %arg4[%c0_12, %c0_13, %c0_14] : memref<1x8x1xi32, #tpu.memory_space<vmem>>, vector<1x8x1xi32>
    %c0_15 = arith.constant 0 : index
    %c0_16 = arith.constant 0 : index
    %c0_17 = arith.constant 0 : index
    %27 = vector.load %arg3[%c0_15, %c0_16, %c0_17] : memref<1x1x8xi32, #tpu.memory_space<vmem>>, vector<1x1x8xi32>
    %28 = vector.broadcast %26 : vector<1x8x1xi32> to vector<1x8x8xi32>
    %29 = vector.broadcast %27 : vector<1x1x8xi32> to vector<1x8x8xi32>
    %30 = arith.cmpi eq, %28, %29 : vector<1x8x8xi32>
    %c0_18 = arith.constant 0 : index
    %c0_19 = arith.constant 0 : index
    %31 = vector.load %arg9[%c0_18, %c0_19] : memref<1x8xf32, #tpu.memory_space<vmem>>, vector<1x8xf32>
    %cst_20 = arith.constant dense<0.000000e+00> : vector<1x8xf32>
    %32 = vector.multi_reduction <add>, %25, %cst_20 [2] : vector<1x8x8xf32> to vector<1x8xf32>
    %33 = arith.addf %31, %32 : vector<1x8xf32>
    %c0_21 = arith.constant 0 : index
    %c0_22 = arith.constant 0 : index
    %34 = vector.load %arg9[%c0_21, %c0_22] : memref<1x8xf32, #tpu.memory_space<vmem>>, vector<1x8xf32>
    tpu.vector_store %arg9[%c0_21, %c0_22], %33 {strides = array<i32>} : memref<1x8xf32, #tpu.memory_space<vmem>>, vector<1x8xf32>,
    %c0_23 = arith.constant 0 : index
    %c0_24 = arith.constant 0 : index
    %35 = vector.load %arg10[%c0_23, %c0_24] : memref<1x8xf32, #tpu.memory_space<vmem>>, vector<1x8xf32>
    %cst_25 = arith.constant 0.000000e+00 : f32
    %36 = vector.broadcast %cst_25 : f32 to vector<1x8x8xf32>
    %37 = arith.select %30, %25, %36 : vector<1x8x8xi1>, vector<1x8x8xf32>
    %cst_26 = arith.constant dense<0.000000e+00> : vector<1x8xf32>
    %38 = vector.multi_reduction <add>, %37, %cst_26 [2] : vector<1x8x8xf32> to vector<1x8xf32>
    %39 = arith.addf %35, %38 : vector<1x8xf32>
    %c0_27 = arith.constant 0 : index
    %c0_28 = arith.constant 0 : index
    %40 = vector.load %arg10[%c0_27, %c0_28] : memref<1x8xf32, #tpu.memory_space<vmem>>, vector<1x8xf32>
    tpu.vector_store %arg10[%c0_27, %c0_28], %39 {strides = array<i32>} : memref<1x8xf32, #tpu.memory_space<vmem>>, vector<1x8xf32>,
    %c0_i32_29 = arith.constant 0 : i32
    %41 = arith.cmpi eq, %arg1, %c0_i32_29 : i32
    %42 = arith.extui %41 : i1 to i32
    %c0_i32_30 = arith.constant 0 : i32
    %43 = arith.cmpi ne, %42, %c0_i32_30 : i32
    scf.if %43 {
      %c0_31 = arith.constant 0 : index
      %c0_32 = arith.constant 0 : index
      %44 = vector.load %arg9[%c0_31, %c0_32] : memref<1x8xf32, #tpu.memory_space<vmem>>, vector<1x8xf32>
      %c0_33 = arith.constant 0 : index
      %c0_34 = arith.constant 0 : index
      %45 = vector.load %arg10[%c0_33, %c0_34] : memref<1x8xf32, #tpu.memory_space<vmem>>, vector<1x8xf32>
      %c0_35 = arith.constant 0 : index
      %c0_36 = arith.constant 0 : index
      %c0_37 = arith.constant 0 : index
      %46 = vector.load %arg6[%c0_35, %c0_36, %c0_37] : memref<1x1x8xf32, #tpu.memory_space<vmem>>, vector<1x1x8xf32>
      %47 = vector.shape_cast %46 : vector<1x1x8xf32> to vector<1x8xf32>
      %cst_38 = arith.constant 5.000000e-01 : f32
      %48 = vector.broadcast %cst_38 : f32 to vector<1x8xf32>
      %49 = arith.cmpf ogt, %47, %48 : vector<1x8xf32>
      %cst_39 = arith.constant 0.000000e+00 : f32
      %50 = vector.broadcast %cst_39 : f32 to vector<1x8xf32>
      %51 = arith.cmpf ogt, %45, %50 : vector<1x8xf32>
      %52 = arith.andi %51, %49 : vector<1x8xi1>
      %cst_40 = arith.constant 1.000000e+00 : f32
      %53 = vector.broadcast %cst_40 : f32 to vector<1x8xf32>
      %54 = arith.select %52, %45, %53 : vector<1x8xi1>, vector<1x8xf32>
      %cst_41 = arith.constant 1.000000e+00 : f32
      %55 = vector.broadcast %cst_41 : f32 to vector<1x8xf32>
      %56 = arith.select %52, %44, %55 : vector<1x8xi1>, vector<1x8xf32>
      %57 = arith.divf %54, %56 : vector<1x8xf32>
      %58 = math.log %57 : vector<1x8xf32>
      %cst_42 = arith.constant 0.000000e+00 : f32
      %59 = vector.broadcast %cst_42 : f32 to vector<1x8xf32>
      %60 = arith.subf %59, %58 : vector<1x8xf32>
      %cst_43 = arith.constant 0.000000e+00 : f32
      %61 = vector.broadcast %cst_43 : f32 to vector<1x8xf32>
      %62 = arith.select %52, %60, %61 : vector<1x8xi1>, vector<1x8xf32>
      %63 = vector.shape_cast %62 : vector<1x8xf32> to vector<1x1x8xf32>
      %cst_44 = arith.constant dense<0.000000e+00> : vector<1xf32>
      %64 = vector.multi_reduction <add>, %63, %cst_44 [1, 2] : vector<1x1x8xf32> to vector<1xf32>
      %65 = vector.shape_cast %64 : vector<1xf32> to vector<1x1x1xf32>
      %66 = vector.extract %65[0, 0, 0] : f32 from vector<1x1x1xf32>
      %67 = arith.extui %52 : vector<1x8xi1> to vector<1x8xi32>
      %68 = arith.sitofp %67 : vector<1x8xi32> to vector<1x8xf32>
      %69 = vector.shape_cast %68 : vector<1x8xf32> to vector<1x1x8xf32>
      %cst_45 = arith.constant dense<0.000000e+00> : vector<1xf32>
      %70 = vector.multi_reduction <add>, %69, %cst_45 [1, 2] : vector<1x1x8xf32> to vector<1xf32>
      %71 = vector.shape_cast %70 : vector<1xf32> to vector<1x1x1xf32>
      %72 = vector.extract %71[0, 0, 0] : f32 from vector<1x1x1xf32>
      %73 = tpu.iota {dimensions = array<i32: 1>} : vector<1x8x128xi32>
      %c0_i32_46 = arith.constant 0 : i32
      %74 = vector.broadcast %c0_i32_46 : i32 to vector<1x8x128xi32>
      %75 = arith.cmpi eq, %73, %74 : vector<1x8x128xi32>
      %c1_i32 = arith.constant 1 : i32
      %76 = vector.broadcast %c1_i32 : i32 to vector<1x8x128xi32>
      %77 = arith.cmpi eq, %73, %76 : vector<1x8x128xi32>
      %cst_47 = arith.constant 0.000000e+00 : f32
      %78 = vector.broadcast %72 : f32 to vector<1x8x128xf32>
      %79 = vector.broadcast %cst_47 : f32 to vector<1x8x128xf32>
      %80 = arith.select %77, %78, %79 : vector<1x8x128xi1>, vector<1x8x128xf32>
      %81 = vector.broadcast %66 : f32 to vector<1x8x128xf32>
      %82 = arith.select %75, %81, %80 : vector<1x8x128xi1>, vector<1x8x128xf32>
      %c0_48 = arith.constant 0 : index
      %c0_49 = arith.constant 0 : index
      %c0_50 = arith.constant 0 : index
      %83 = vector.load %arg7[%c0_48, %c0_49, %c0_50] : memref<1x8x128xf32, #tpu.memory_space<vmem>>, vector<1x8x128xf32>
      tpu.vector_store %arg7[%c0_48, %c0_49, %c0_50], %82 {strides = array<i32>} : memref<1x8x128xf32, #tpu.memory_space<vmem>>, vector<1x8x128xf32>,
    } else {
    }
    return
  }
  func.func @transform_0(%arg0: i32, %arg1: i32) -> (i32, i32, i32) {
    %c0_i32 = arith.constant 0 : i32
    %c0_i32_0 = arith.constant 0 : i32
    %c0_i32_1 = arith.constant 0 : i32
    return %arg0, %c0_i32, %c0_i32_0 : i32, i32, i32
  }
  func.func @transform_1(%arg0: i32, %arg1: i32) -> (i32, i32, i32) {
    %c0_i32 = arith.constant 0 : i32
    %c0_i32_0 = arith.constant 0 : i32
    return %arg0, %c0_i32, %arg1 : i32, i32, i32
  }
  func.func @transform_2(%arg0: i32, %arg1: i32) -> (i32, i32, i32) {
    %c0_i32 = arith.constant 0 : i32
    %c0_i32_0 = arith.constant 0 : i32
    %c0_i32_1 = arith.constant 0 : i32
    return %arg0, %c0_i32, %c0_i32_0 : i32, i32, i32
  }
  func.func @transform_3(%arg0: i32, %arg1: i32) -> (i32, i32, i32) {
    %c0_i32 = arith.constant 0 : i32
    %c0_i32_0 = arith.constant 0 : i32
    return %arg0, %c0_i32, %arg1 : i32, i32, i32
  }
  func.func @transform_4(%arg0: i32, %arg1: i32) -> (i32, i32, i32) {
    %c0_i32 = arith.constant 0 : i32
    %c0_i32_0 = arith.constant 0 : i32
    %c0_i32_1 = arith.constant 0 : i32
    return %arg0, %c0_i32, %c0_i32_0 : i32, i32, i32
  }
  func.func @transform_5(%arg0: i32, %arg1: i32) -> (i32, i32, i32) {
    %c0_i32 = arith.constant 0 : i32
    %c0_i32_0 = arith.constant 0 : i32
    %c0_i32_1 = arith.constant 0 : i32
    return %arg0, %c0_i32, %c0_i32_0 : i32, i32, i32
  }
}

</mosaic_0001>

<bundles_post_ra>
// kernel: tpu_custom_call.1
= control target key start
LH: loop header
LB: loop body
LE: loop exit
PB: predicated region body
PF: predicated region fallthrough
CT: control target
= control target key end

     0   :  { %10 = vsyncpa [#allocation6], 0  ;;  %s1088_s0 = inlined_call_operand.vmem [shape: f32[2,8,128], index: 0, kind: input, shape index: {}]   ;;  %s1089_s1 = inlined_call_operand.vmem [shape: s32[2,1,8], index: 1, kind: input, shape index: {}]   ;;  %s1090_s2 = inlined_call_operand.vmem [shape: s32[2,8,1], index: 2, kind: input, shape index: {}]   ;;  %s1091_s3 = inlined_call_operand.vmem [shape: f32[2,1,8], index: 3, kind: input, shape index: {}]   ;;  %s1092_s4 = inlined_call_operand.hbm [shape: f32[2,1,8], index: 4, kind: input, shape index: {}]   ;;  %s1093_s5 = inlined_call_operand.hbm [shape: f32[2,8,128], index: 5, kind: output, shape index: {}]  }
   0x1   :  { %12 = vsyncpa [#allocation6 + $0x1], 0 }
   0x2   :  { %13 = vsyncpa [#allocation7], 0 }
   0x3   :  { %15 = vsyncpa [#allocation7 + $0x1], 0  ;;  %s918_s18 = smov 0   ;;  %s920_s19 = smov 0  }
   0x4   :  { %s922_s20 = smov 0   ;;  %s924_s21 = smov 0  }
   0x5   :  { %s926_s22 = smov 0   ;;  %s928_s23 = smov 0  }
   0x6 LB: > { %s680_s24 = sadd.s32 4294967295, %s884_s23   ;;  %s681_s25 = sadd.s32 4294967294, %s884_s23   ;;  %s884_s23 = sphi %s928_s23, %s21_s23   ;;  %s880_s22 = sphi %s926_s22, %s1104_s22   ;;  %s876_s21 = sphi %s924_s21, %s1103_s21   ;;  %s872_s20 = sphi %s922_s20, %s1102_s20   ;;  %s868_s19 = sphi %s920_s19, %s1101_s19   ;;  %s864_s18 = sphi %s918_s18, %s1100_s18  }
   0x7   : > { %s33_s26 = sadd.s32 1, %s880_s22  ;;  %s148_s27 = sadd.s32 1, %s872_s20 }
   0x8   : > { %p35_p0 = scmp.ge.s32.totalorder %s33_s26, 2  ;;  %p155_p1 = scmp.ne.s32.totalorder %s872_s20, %s868_s19 }
   0x9   : > { %p156_p2 = scmp.eq.s32.totalorder %s884_s23, 0  ;;  %p161_p3 = scmp.ne.s32.totalorder %s868_s19, %s864_s18 }
   0xa   : > { %s1106_s26 = smov (%p35_p0, %s33_s26), 0  ;;  %p162_p5 = scmp.eq.s32.totalorder %s680_s24, 0 }
   0xb   : > { %p959_p4 = por %p156_p2, %p155_p1  ;;  %s145_s29 = ssub.s32 %s880_s22, %s1106_s26 }
   0xc   : > { %p185_p6 = scmp.eq.s32.totalorder %s680_s24, 1  ;;  %p146_p7 = scmp.eq.s32.totalorder %s145_s29, 0 }
   0xd   : > { %p965_p8 = por %p162_p5, %p161_p3  ;;  %p191_p10 = scmp.eq.s32.totalorder %s681_s25, 1 }
   0xe   : > { %p969_p9 = por %p185_p6, %p155_p1  ;;  %p683_p12 = scmp.ge.s32.totalorder %s884_s23, 2 }
   0xf   : > { %s974_s7 = scalar_select %p146_p7, %s872_s20, %s148_s27  }
  0x10   : > { %p976_p11 = por %p191_p10, %p161_p3  ;;  %p709_p13 = scmp.lt.s32.totalorder %s884_s23, 2 }
  0x11   : > { %s243_s9 = sand.u32 1, %s872_s20   ;;  %s249_s12 = scalar_lea.hbm %s1092_s4, %s880_s22 }
  0x12   : > { %s246_s13 = scalar_lea.vmem [#allocation5], %s243_s9  ;;  %s251_s15 = sshll.u32 %s249_s12, 4  ;;  %s252_s15 = int_to_ptr.hbm [resolvable:$true] %s251_s15 }
  0x13   : > { %s253_s14 = sshll.u32 %s246_s13, 4  ;;  %p702_p0 = pnand %p709_p13, %p959_p4  ;;  %s254_s14 = int_to_ptr.vmem [resolvable:$true] %s253_s14 }
  0x14   : > { %p684_p1 = scmp.ge.s32.totalorder %s884_s23, 1  ;;  %p258_p2 = scmp.lt.s32.totalorder %s884_s23, 3 }
  0x15   : > { %s244_s16 = scalar_lea.sflag [#allocation6], %s243_s9 }
  0x16   : > { %704 = dma.hbm_to_vmem [thread:$0]  (!%p702_p0), %s252_s15, 16, %s254_s14, %s244_s16  }
  0x17   : > { %p259_p3 = pnand %p684_p1, %p258_p2 }
  0x18   : > { %s992_s17 = sand.u32 (!%p259_p3), 1, %s868_s19  }
  0x19   : > { %262 = sbr.rel (%p259_p3) target bundleno = 797 (0x31d), region = 40  ;;  %s265_s24 = scalar_lea.sflag (!%p259_p3), [#allocation6], %s992_s17 }
  0x1a   : > { %s267_s25 = scalar_lea.vmem (!%p259_p3), [#allocation5], %s992_s17 }
  0x1e   : > { %855 = dma.done.wait (%p965_p8), %s265_s24, 16  }
  0x1f   : > { %857 = vsyncadd (%p965_p8), %s265_s24, 4294967280  ;;  %p314_p4 = scmp.lt.s32.totalorder %s876_s21, 1  ;;  %v886_v3 = vmov 0   ;;  %v383_v15 = vlaneseq  ;;  %vm407_vm7 = vcmask 64512   ;;  %vm355_vm9 = vcmask 57344  }
  0x20   : > { %761 = vset.pattern.permute.xlu0 %v886_v3  ;;  %762 = vset.pattern.permute.xlu2 %v886_v3  ;;  %v887_v40 = vmov 0.0   ;;  %v486_v57 = vld [vmem:[%s267_s25] sm:$0x1]  ;;  %s685_s25 = sshll.u32 %s992_s17, 3 }
  0x21   : > { %s1002_s27 = scalar_select %p314_p4, %s876_s21, 1  ;;  %v1019_v19 = vshrl.u32 %v383_v15, 7  ;;  %v1021_v20 = vand.u32 127, %v383_v15  ;;  %357 = vst.msk [vmem:[#allocation4] sm:$0x1] %vm355_vm9, %v887_v40  ;;  %vm487_vm10 = vcmp.gt.f32.partialorder %v486_v57, 0.5 }
  0x22   : > { %356 = vst.msk [vmem:[#allocation3] sm:$0x1] %vm355_vm9, %v887_v40  ;;  %s313_s11 = scalar_lea.vmem [#allocation8], %s685_s25  ;;  %s822_s25 = scalar_lea.hbm %s1093_s5, 16 }
  0x23   : > { %s686_s28 = sshll.u32 %s1002_s27, 3  ;;  %s323_s15 = scalar_lea.vmem %s1089_s1, %s1002_s27  ;;  %vm389_vm4 = vcmp.ne.s32.totalorder %v1019_v19, %v1021_v20 }
  0x24   : > { %s317_s10 = scalar_lea.vmem %s1088_s0, %s686_s28  ;;  %s327_s13 = scalar_lea.vmem %s1090_s2, %s686_s28  ;;  %v763_v24 = vld [vmem:[%s323_s15] ss:$0 sm:$0xff] }
  0x25   : > { %v338_v0 = vld [vmem:[%s317_s10] sm:$0xff]  ;;  %s333_s28 = scalar_lea.vmem %s1091_s3, %s1002_s27  ;;  %s690_s27 = sshll.u32 %s876_s21, 3 }
  0x26   : > { %v339_v1 = vmul.f32 %v338_v0, %v338_v0  ;;  %v399_v2 = vld [vmem:[%s327_s13] sm:$0xff]  ;;  %s551_s10 = scalar_lea.hbm %s1093_s5, %s690_s27  ;;  %s553_s12 = sshll.u32 %s313_s11, 4  ;;  %s554_s12 = int_to_ptr.vmem [resolvable:$true] %s553_s12 }
  0x27   : > { %v390_v14 = vld [vmem:[%s333_s28] sm:$0x1]  ;;  %s555_s30 = sshll.u32 %s551_s10, 4  ;;  %s541_s21 = scalar_lea.sflag [#allocation7], %s992_s17  ;;  %s556_s30 = int_to_ptr.hbm [resolvable:$true] %s555_s30 }
  0x28   : > { %340 = vadd.xlane.f32.xlu0 %v339_v1  ;;  %vm391_vm3 = vcmp.gt.f32.partialorder %v390_v14, 0.5  ;;  %v444_v51 = vld [vmem:[#allocation4] sm:$0x1]  ;;  %s816_s15 = sshra.s32 %s556_s30, 4  ;;  %s817_s15 = int_to_ptr.hbm [resolvable:$true] %s816_s15 }
  0x29   : > { %v392_v16 = vsel %vm391_vm3, 1, %v886_v3  ;;  %v406_v55 = vld [vmem:[#allocation3] sm:$0x1]  ;;  %s818_s16 = scalar_lea.hbm %s817_s15, 8  ;;  %p823_p8 = scmp.lt.s32.totalorder %s817_s15, %s1093_s5 }
  0x2a   : > { %v393_v21 = vperm.slane %v392_v16, 0  ;;  %p819_p5 = scmp.ne.s32.totalorder %s817_s15, %s818_s16  ;;  %p824_p10 = scmp.lt.s32.totalorder %s822_s25, %s818_s16 }
  0x2c   : > { %vm394_vm5 = vcmp.eq.s32.totalorder %v393_v21, 1  ;;  %p820_p6 = pnand %p819_p5, %p969_p9  ;;  %p825_p13 = por %p824_p10, %p823_p8 }
  0x2d   : > { %vm395_vm6 = vmand %vm389_vm4, %vm394_vm5 }
  0x2e   : > { %p821_p7 = pneg %p820_p6 }
  0x30   : > { %p826_p0 = pnand %p825_p13, %p821_p7 }
  0x3c   : > { %402 = vperm.xlu0 %761, %v399_v2  }
  0x9b   : > { %v341_v4 = vpop.xlane.xlu0 %340 }
  0x9c   : > { %v342_v5 = vmax.f32 %v341_v4, 1e-24 }
  0x9e   : > { %764 = vrsqrt.f32 %v342_v5  ;;  %vm349_vm1 = vweird.f32 %v342_v5 }
  0xa4   : > { %v765_v6 = vpop.eup %764 }
  0xa5   : > { %v344_v7 = vmul.f32 %v765_v6, %v342_v5  ;;  %vm350_vm0 = vweird.f32 %v765_v6 }
  0xa6   : > { %vm351_vm2 = vmor %vm349_vm1, %vm350_vm0  ;;  %vm534_vm1 = vcmp.eq.s32.totalorder %v1019_v19, 1 }
  0xa7   : > { %v345_v8 = vmul.f32 %v765_v6, %v344_v7 }
  0xa9   : > { %v346_v9 = vmul.f32 0.5, %v345_v8 }
  0xab   : > { %v347_v10 = vsub.f32 1.5, %v346_v9 }
  0xad   : > { %v348_v11 = vmul.f32 %v765_v6, %v347_v10 }
  0xae   : > { %v403_v25 = vpop.permute.xlu0 %402 }
  0xaf   : > { %v352_v12 = vsel %vm351_vm2, %v765_v6, %v348_v11  ;;  %vm405_vm8 = vcmp.eq.s32.totalorder %v403_v25, %v763_v24  ;;  %vm533_vm2 = vcmp.eq.s32.totalorder %v1019_v19, 0 }
  0xb0   : > { %v353_v13 = vmul.f32 %v352_v12, %v338_v0 }
  0xb2   : > { %377 = vmatpush.xpose.msra.mxu0 %v353_v13 }
  0xb5   : > { %378 = vmatmul.f32.vlgmr.msra.gmra.mxu0 %v353_v13 }
 0x132   : > { %v379_v17 = vpop.f32.mrf.mxu0 }
 0x133   : > { %v382_v18 = vmul.f32 10.0, %v379_v17 }
 0x135   : > { %v396_v22 = vmul.f32 1.442695, %v382_v18 }
 0x137   : > { %766 = vpow2.f32 %v396_v22 }
 0x13d   : > { %v767_v23 = vpop.eup %766 }
 0x13e   : > { %v398_v26 = vsel %vm395_vm6, %v767_v23, 0.0 }
 0x13f   : > { %v408_v27 = vsel %vm407_vm7, %v398_v26, 0.0  ;;  %v445_v28 = vsel %vm405_vm8, %v398_v26, 0.0 }
 0x140   : > { %409 = vadd.xlane.f32.xlu1 %v408_v27  ;;  %v446_v29 = vsel %vm407_vm7, %v445_v28, 0.0 }
 0x148   : > { %447 = vadd.xlane.f32.xlu1 %v446_v29 }
 0x1b3   : > { %v410_v30 = vpop.xlane.xlu1 %409 }
 0x1b4   : > { %v412_v31 = vperm.slane %v410_v30, 0  ;;  %v413_v32 = vperm.slane %v410_v30, 1  ;;  %v414_v33 = vperm.slane %v410_v30, 2  ;;  %v415_v34 = vperm.slane %v410_v30, 3 }
 0x1b5   : > { %v416_v35 = vperm.slane %v410_v30, 4  ;;  %v417_v36 = vperm.slane %v410_v30, 5  ;;  %v418_v37 = vperm.slane %v410_v30, 6  ;;  %v419_v38 = vperm.slane %v410_v30, 7 }
 0x1b6   : > { %420 = vst [vmem:[#allocation1] ss:$9 sm:$0xff] %v412_v31 }
 0x1b7   : > { %422 = vst [vmem:[#allocation1 + $0x1] ss:$9 sm:$0xff] %v413_v32 }
 0x1b8   : > { %424 = vst [vmem:[#allocation1 + $0x2] ss:$9 sm:$0xff] %v414_v33 }
 0x1b9   : > { %426 = vst [vmem:[#allocation1 + $0x3] ss:$9 sm:$0xff] %v415_v34 }
 0x1ba   : > { %428 = vst [vmem:[#allocation1 + $0x4] ss:$9 sm:$0xff] %v416_v35 }
 0x1bb   : > { %430 = vst [vmem:[#allocation1 + $0x5] ss:$9 sm:$0xff] %v417_v36  ;;  %v448_v39 = vpop.xlane.xlu1 %447 }
 0x1bc   : > { %432 = vst [vmem:[#allocation1 + $0x6] ss:$9 sm:$0xff] %v418_v37  ;;  %v450_v41 = vperm.slane %v448_v39, 0  ;;  %v451_v42 = vperm.slane %v448_v39, 1  ;;  %v452_v43 = vperm.slane %v448_v39, 2  ;;  %v453_v45 = vperm.slane %v448_v39, 3 }
 0x1bd   : > { %434 = vst [vmem:[#allocation1 + $0x7] ss:$9 sm:$0xff] %v419_v38  ;;  %v454_v46 = vperm.slane %v448_v39, 4  ;;  %v455_v47 = vperm.slane %v448_v39, 5  ;;  %v456_v48 = vperm.slane %v448_v39, 6  ;;  %v457_v49 = vperm.slane %v448_v39, 7 }
 0x1c4   : > { %v435_v44 = vld [vmem:[#allocation1] sm:$0xff] }
 0x1c5   : > { %458 = vst [vmem:[#allocation1] ss:$9 sm:$0xff] %v450_v41 }
 0x1c6   : > { %460 = vst [vmem:[#allocation1 + $0x1] ss:$9 sm:$0xff] %v451_v42 }
 0x1c7   : > { %462 = vst [vmem:[#allocation1 + $0x2] ss:$9 sm:$0xff] %v452_v43 }
 0x1c8   : > { %464 = vst [vmem:[#allocation1 + $0x3] ss:$9 sm:$0xff] %v453_v45 }
 0x1c9   : > { %466 = vst [vmem:[#allocation1 + $0x4] ss:$9 sm:$0xff] %v454_v46 }
 0x1ca   : > { %468 = vst [vmem:[#allocation1 + $0x5] ss:$9 sm:$0xff] %v455_v47 }
 0x1cb   : > { %470 = vst [vmem:[#allocation1 + $0x6] ss:$9 sm:$0xff] %v456_v48 }
 0x1cc   : > { %472 = vst [vmem:[#allocation1 + $0x7] ss:$9 sm:$0xff] %v457_v49 }
 0x1d3   : > { %v473_v50 = vld [vmem:[#allocation1] sm:$0xff] }
 0x1d4   : > { %475 = vperm.xlu2 %762, %v473_v50  }
 0x1dc   : > { %437 = vperm.xlu2 %762, %v435_v44  }
 0x22e   : > { %v476_v52 = vpop.permute.xlu2 %475 }
 0x22f   : > { %v477_v53 = vperm.slane %v476_v52, %v1021_v20 }
 0x231   : > { %v479_v54 = vadd.f32 %v477_v53, %v444_v51 }
 0x233   : > { %480 = vst.msk [vmem:[#allocation4] sm:$0x1] %vm355_vm9, %v479_v54 }
 0x236   : > { %v438_v56 = vpop.permute.xlu2 %437 }
 0x237   : > { %v439_v58 = vperm.slane %v438_v56, %v1021_v20 }
 0x239   : > { %v441_v59 = vadd.f32 %v439_v58, %v406_v55 }
 0x23a   : > { %v485_v60 = vld [vmem:[#allocation4] sm:$0x1] }
 0x23b   : > { %443 = vst.msk [vmem:[#allocation3] sm:$0x1] %vm355_vm9, %v441_v59  ;;  %vm488_vm11 = vcmp.gt.f32.partialorder %v485_v60, 0.0 }
 0x23c   : > { %vm1033_vm12 = vmand %vm488_vm11, %vm487_vm10 }
 0x23d   : > { %v688_v62 = vsel %vm1033_vm12, 1.0, %v887_v40  ;;  %v490_v11 = vsel %vm1033_vm12, %v485_v60, 1.0 }
 0x23e   : > { %v523_v63 = vsel %vm355_vm9, %v688_v62, 0.0 }
 0x23f   : > { %524 = vadd.xlane.f32.xlu2 %v523_v63 }
 0x242   : > { %v484_v0 = vld [vmem:[#allocation3] sm:$0x1] }
 0x243   : > { %v491_v1 = vsel %vm1033_vm12, %v484_v0, 1.0 }
 0x244   : > { %768 = vrcp.f32 %v491_v1  ;;  %v503_v5 = vand.u32 2147483648, %v491_v1  ;;  %v501_v7 = vand.u32 2147483647, %v491_v1  ;;  %vm497_vm14 = vweird.f32 %v491_v1 }
 0x246   : > { %v504_v9 = vor.u32 1.1754944e-38, %v503_v5  ;;  %vm502_vm0 = vcmp.eq.f32.partialorder %v501_v7, 8.507059e+37 }
 0x24a   : > { %v769_v2 = vpop.eup %768 }
 0x24b   : > { %v493_v3 = vmul.f32 %v769_v2, %v491_v1  ;;  %vm498_vm13 = vweird.f32 %v769_v2 }
 0x24c   : > { %vm499_vm15 = vmor %vm497_vm14, %vm498_vm13 }
 0x24d   : > { %v494_v4 = vsub.f32 1.0, %v493_v3 }
 0x24f   : > { %v495_v6 = vmul.f32 %v769_v2, %v494_v4 }
 0x251   : > { %v496_v8 = vadd.f32 %v769_v2, %v495_v6 }
 0x253   : > { %v500_v10 = vsel %vm499_vm15, %v769_v2, %v496_v8 }
 0x254   : > { %v505_v12 = vsel %vm502_vm0, %v504_v9, %v500_v10 }
 0x255   : > { %v506_v13 = vmul.f32 %v505_v12, %v490_v11 }
 0x257   : > { %770 = vlog2.f32 %v506_v13 }
 0x25d   : > { %v771_v14 = vpop.eup %770 }
 0x25e   : > { %v508_v15 = vmul.f32 0.6931472, %v771_v14 }
 0x260   : > { %v509_v16 = vsub.f32 0.0, %v508_v15 }
 0x262   : > { %v510_v17 = vsel %vm1033_vm12, %v509_v16, 0.0 }
 0x263   : > { %v511_v18 = vsel %vm355_vm9, %v510_v17, 0.0 }
 0x264   : > { %512 = vadd.xlane.f32.xlu1 %v511_v18 }
 0x2b2   : > { %v525_v20 = vpop.xlane.xlu2 %524 }
 0x2b3   : > { %v526_v21 = vrot.slane %v525_v20, 4 }
 0x2b5   : > { %v527_v22 = vadd.f32 %v526_v21, %v525_v20 }
 0x2b7   : > { %v528_v23 = vrot.slane %v527_v22, 2 }
 0x2b9   : > { %v529_v27 = vadd.f32 %v528_v23, %v527_v22 }
 0x2bb   : > { %v530_v30 = vrot.slane %v529_v27, 1 }
 0x2bd   : > { %v531_v33 = vadd.f32 %v530_v30, %v529_v27 }
 0x2d7   : > { %v513_v24 = vpop.xlane.xlu1 %512 }
 0x2d8   : > { %v514_v25 = vrot.slane %v513_v24, 4 }
 0x2da   : > { %v515_v26 = vadd.f32 %v514_v25, %v513_v24 }
 0x2dc   : > { %v516_v28 = vrot.slane %v515_v26, 2 }
 0x2de   : > { %v517_v29 = vadd.f32 %v516_v28, %v515_v26 }
 0x2e0   : > { %v518_v31 = vrot.slane %v517_v29, 1 }
 0x2e2   : > { %v519_v32 = vadd.f32 %v518_v31, %v517_v29 }
 0x2e4   : > { %693 = vpush %v519_v32 }
 0x2e5   : > { %695 = vpush %v531_v33 }
 0x315   : > { %s694_s13 = spop %693 }
 0x316   : > { %v537_v34 = vstv %s694_s13  ;;  %s696_s14 = spop %695 }
 0x317   : > { %v535_v35 = vstv %s696_s14 }
 0x318   : > { %v536_v36 = vsel %vm534_vm1, %v535_v35, 0.0 }
 0x319   : > { %v538_v37 = vsel %vm533_vm2, %v537_v34, %v536_v36 }
 0x31a   : > { %539 = vst [vmem:[%s313_s11] sm:$0xff] %v538_v37 }
 0x31b   : > { %829 = shalt.err (!%p826_p0)
}
 0x31c   : > { %699 = dma.vmem_to_hbm [thread:$0]  (%p969_p9), %s554_s12, 128, %s556_s30, %s541_s21  }
 0x31d PF: > { %s567_s17 = sand.u32 1, %s864_s18   ;;  %p706_p1 = pnand %p683_p12, %p976_p11 }
 0x31e   : > { %s568_s9 = scalar_lea.sflag [#allocation7], %s567_s17 }
 0x31f   : > { %p707_p2 = pneg %p706_p1 }
 0x321   : > { %859 = dma.done.wait (%p707_p2), %s568_s9, 128  }
 0x322   : > { %861 = vsyncadd (%p707_p2), %s568_s9, 4294967168  ;;  %s21_s23 = sadd.s32 1, %s884_s23   ;;  %s1100_s18 = smov %s868_s19 }
 0x323   : > { %p18_p3 = scmp.ge.s32.totalorder %s21_s23, 4   ;;  %s1101_s19 = smov %s872_s20 }
 0x324   : > { %s1102_s20 = smov %s974_s7  ;;  %s1103_s21 = smov %s880_s22 }
 0x325   : > { %s1104_s22 = smov %s1106_s26  ;;  %20 = sbr.rel (!%p18_p3) target bundleno = 6 (0x6), region = 120 }
 0x32a   :  { %574 = vsyncpa [#allocation6], 1 }
 0x32b   :  { %576 = vsyncpa [#allocation6 + $0x1], 1 }
 0x32c   :  { %577 = vsyncpa [#allocation7], 1 }
 0x32d   :  { %579 = vsyncpa [#allocation7 + $0x1], 1 }

</bundles_post_ra>
